<compile_context>
chip_gen: v5e
topology: v5e:2x2
jax: 0.10.0
libtpu: 0.0.40
codegen_flags: <defaults>
</compile_context>

<pallas_src>
import jax
import jax.numpy as jnp
from jax import lax
from jax.experimental import pallas as pl
from jax.experimental.pallas import tpu as pltpu

INPUT_SIZE = 50    # num_nodes
HIDDEN_SIZE = 64
OUTPUT_SIZE = 50   # num_nodes

NO_GRID_MAX_BATCH = 256   # at/below this, a single un-gridded call has least overhead
TB_MAX = 1024             # batch-tile cap for the gridded path (~0.4 MiB/tile dbl-buffered)


def _round_up(n, m):
    return ((n + m - 1) // m) * m


def qnetwork_kernel(x_ref, w1_ref, b1_ref, w2_ref, b2_ref, out_ref):
    # fc1: f32 MXU matmul (HIGHEST precision -> f32-accurate multi-pass),
    # bias add + ReLU on the VPU in f32.
    h = jnp.dot(x_ref[...], w1_ref[...],
                preferred_element_type=jnp.float32,
                precision=lax.Precision.HIGHEST)
    h = jnp.maximum(h + b1_ref[...], 0.0)
    # fc2: same pattern; store at the true (tb, 50) output width (masked lane
    # stores hide under abundant DMA slack in this mem-bound kernel).
    y = jnp.dot(h, w2_ref[...],
                preferred_element_type=jnp.float32,
                precision=lax.Precision.HIGHEST)
    out_ref[...] = (y + b2_ref[...]).astype(out_ref.dtype)


@jax.jit
def qnetwork_forward(x, w1, b1, w2, b2):
    """x: (B, INPUT_SIZE) f32; w* stored (in, out); b* stored (1, out).

    Returns (B, OUTPUT_SIZE) f32 — no padding, no post-call slicing.
    """
    B, in_dim = x.shape
    hid = w1.shape[1]
    out_dim = w2.shape[1]

    flops = 2 * B * (in_dim * hid + hid * out_dim)
    bytes_accessed = 4 * (B * in_dim + in_dim * hid + hid
                          + hid * out_dim + out_dim + B * out_dim)
    cost = pl.CostEstimate(flops=flops, transcendentals=0,
                           bytes_accessed=bytes_accessed)

    out_shape = jax.ShapeDtypeStruct((B, out_dim), jnp.float32)

    if B <= NO_GRID_MAX_BATCH:
        # Tiny batch: overhead-bound. No grid -> no pipelined 1-trip loop, no
        # per-step block bookkeeping; whole arrays live in VMEM (<100 KiB).
        return pl.pallas_call(
            qnetwork_kernel,
            out_shape=out_shape,
            in_specs=[pl.BlockSpec(memory_space=pltpu.MemorySpace.VMEM)] * 5,
            out_specs=pl.BlockSpec(memory_space=pltpu.MemorySpace.VMEM),
            cost_estimate=cost,
        )(x, w1, b1, w2, b2)

    # Gridded path: tile the batch axis only. Pick tb so that
    #  * tb is a multiple of 8 (sublane alignment of the block),
    #  * the grid always has >= 2 steps (v7x: both TensorCores get work),
    #  * padding waste is zero (ragged last block is boundary-masked by Pallas).
    tb = min(TB_MAX, _round_up(pl.cdiv(B, 2), 8))
    grid = (pl.cdiv(B, tb),)

    return pl.pallas_call(
        qnetwork_kernel,
        out_shape=out_shape,
        grid_spec=pltpu.PrefetchScalarGridSpec(
            num_scalar_prefetch=0,
            grid=grid,
            in_specs=[
                pl.BlockSpec((tb, in_dim), lambda i: (i, 0)),       # x: batch-tiled
                pl.BlockSpec((in_dim, hid), lambda i: (0, 0)),      # w1: VMEM-resident
                pl.BlockSpec((1, hid), lambda i: (0, 0)),           # b1
                pl.BlockSpec((hid, out_dim), lambda i: (0, 0)),     # w2
                pl.BlockSpec((1, out_dim), lambda i: (0, 0)),       # b2
            ],
            out_specs=pl.BlockSpec((tb, out_dim), lambda i: (i, 0)),
        ),
        compiler_params=pltpu.CompilerParams(
            dimension_semantics=("parallel",)),
        cost_estimate=cost,
    )(x, w1, b1, w2, b2)


def init_params(key):
    # Mirrors PyTorch nn.Linear init: U(-1/sqrt(fan_in), 1/sqrt(fan_in)).
    # Weights stored (in, out) so the kernel computes x @ W + b.
    k1, k2, k3, k4 = jax.random.split(key, 4)
    bound1 = 1.0 / jnp.sqrt(INPUT_SIZE)
    bound2 = 1.0 / jnp.sqrt(HIDDEN_SIZE)
    w1 = jax.random.uniform(k1, (INPUT_SIZE, HIDDEN_SIZE), jnp.float32,
                            -bound1, bound1)
    b1 = jax.random.uniform(k2, (1, HIDDEN_SIZE), jnp.float32, -bound1, bound1)
    w2 = jax.random.uniform(k3, (HIDDEN_SIZE, OUTPUT_SIZE), jnp.float32,
                            -bound2, bound2)
    b2 = jax.random.uniform(k4, (1, OUTPUT_SIZE), jnp.float32, -bound2, bound2)
    return w1, b1, w2, b2


if __name__ == "__main__":
    import numpy as np

    key = jax.random.PRNGKey(0)
    kx, kp, kb = jax.random.split(key, 3)
    w1, b1, w2, b2 = init_params(kp)

    def reference(xa):
        xn, w1n, b1n, w2n, b2n = (np.asarray(a, np.float32)
                                  for a in (xa, w1, b1, w2, b2))
        h = np.maximum(xn @ w1n + b1n, 0.0)
        return h @ w2n + b2n

    # Small-batch path (no grid), batch=2 — the common RL inference case.
    x = jax.random.normal(kx, (2, INPUT_SIZE), jnp.float32)
    out = jax.block_until_ready(qnetwork_forward(x, w1, b1, w2, b2))
    assert out.shape == (2, OUTPUT_SIZE)
    assert np.allclose(np.asarray(out), reference(x), atol=5e-3, rtol=5e-3)

    # Gridded path with a ragged batch: tb=304 -> 2 "parallel" grid steps,
    # last block boundary-masked (no wrapper padding, no post-call slice).
    xb = jax.random.normal(kb, (600, INPUT_SIZE), jnp.float32)
    outb = jax.block_until_ready(qnetwork_forward(xb, w1, b1, w2, b2))
    assert outb.shape == (600, OUTPUT_SIZE)
    assert np.allclose(np.asarray(outb), reference(xb), atol=5e-3, rtol=5e-3)

    print("KERNEL_OK")
</pallas_src>

<mosaic_0001>
module attributes {stable_mosaic.version = 11 : i64} {
  func.func @qnetwork_kernel(%arg0: memref<2x50xf32, #tpu.memory_space<vmem>>, %arg1: memref<50x64xf32, #tpu.memory_space<vmem>>, %arg2: memref<1x64xf32, #tpu.memory_space<vmem>>, %arg3: memref<64x50xf32, #tpu.memory_space<vmem>>, %arg4: memref<1x50xf32, #tpu.memory_space<vmem>>, %arg5: memref<2x50xf32, #tpu.memory_space<vmem>>) attributes {dimension_semantics = [], scalar_prefetch = 0 : i64, scratch_operands = 0 : i64, tpu.core_type = #tpu.core_type<tc>} {
    %c0 = arith.constant 0 : index
    %c0_0 = arith.constant 0 : index
    %0 = vector.load %arg0[%c0, %c0_0] : memref<2x50xf32, #tpu.memory_space<vmem>>, vector<2x50xf32>
    %c0_1 = arith.constant 0 : index
    %c0_2 = arith.constant 0 : index
    %1 = vector.load %arg1[%c0_1, %c0_2] : memref<50x64xf32, #tpu.memory_space<vmem>>, vector<50x64xf32>
    %cst = arith.constant dense<0.000000e+00> : vector<2x64xf32>
    %2 = tpu.matmul %0, %1, %cst {dimension_numbers = #tpu.dot_dimension_numbers<[1], [0], [0], [1], [0, 0, 1, 1], [], []>, precision = #tpu.contract_precision<fp32>} : vector<2x50xf32>, vector<50x64xf32>, vector<2x64xf32> -> vector<2x64xf32>
    %c0_3 = arith.constant 0 : index
    %c0_4 = arith.constant 0 : index
    %3 = vector.load %arg2[%c0_3, %c0_4] : memref<1x64xf32, #tpu.memory_space<vmem>>, vector<1x64xf32>
    %4 = vector.broadcast %3 : vector<1x64xf32> to vector<2x64xf32>
    %5 = arith.addf %2, %4 : vector<2x64xf32>
    %cst_5 = arith.constant 0.000000e+00 : f32
    %6 = vector.broadcast %cst_5 : f32 to vector<2x64xf32>
    %7 = arith.maximumf %5, %6 : vector<2x64xf32>
    %c0_6 = arith.constant 0 : index
    %c0_7 = arith.constant 0 : index
    %8 = vector.load %arg3[%c0_6, %c0_7] : memref<64x50xf32, #tpu.memory_space<vmem>>, vector<64x50xf32>
    %cst_8 = arith.constant dense<0.000000e+00> : vector<2x50xf32>
    %9 = tpu.matmul %7, %8, %cst_8 {dimension_numbers = #tpu.dot_dimension_numbers<[1], [0], [0], [1], [0, 0, 1, 1], [], []>, precision = #tpu.contract_precision<fp32>} : vector<2x64xf32>, vector<64x50xf32>, vector<2x50xf32> -> vector<2x50xf32>
    %c0_9 = arith.constant 0 : index
    %c0_10 = arith.constant 0 : index
    %10 = vector.load %arg4[%c0_9, %c0_10] : memref<1x50xf32, #tpu.memory_space<vmem>>, vector<1x50xf32>
    %11 = vector.broadcast %10 : vector<1x50xf32> to vector<2x50xf32>
    %12 = arith.addf %9, %11 : vector<2x50xf32>
    %c0_11 = arith.constant 0 : index
    %c0_12 = arith.constant 0 : index
    %13 = vector.load %arg5[%c0_11, %c0_12] : memref<2x50xf32, #tpu.memory_space<vmem>>, vector<2x50xf32>
    tpu.vector_store %arg5[%c0_11, %c0_12], %12 {strides = array<i32>} : memref<2x50xf32, #tpu.memory_space<vmem>>, vector<2x50xf32>,
    return
  }
}

</mosaic_0001>

<bundles_post_ra>
// kernel: qnetwork_forward.1
= control target key start
LH: loop header
LB: loop body
LE: loop exit
PB: predicated region body
PF: predicated region fallthrough
CT: control target
= control target key end

     0   :  { %vm37_vm0 = vcmask 1041408   ;;  %vm33_vm1 = vcmask 408576   ;;  %s783_s0 = inlined_call_operand.vmem [shape: f32[2,50], index: 0, kind: input, shape index: {}]   ;;  %s784_s1 = inlined_call_operand.vmem [shape: f32[50,64], index: 1, kind: input, shape index: {}]   ;;  %s785_s2 = inlined_call_operand.vmem [shape: f32[1,64], index: 2, kind: input, shape index: {}]   ;;  %s786_s3 = inlined_call_operand.vmem [shape: f32[64,50], index: 3, kind: input, shape index: {}]   ;;  %s787_s4 = inlined_call_operand.vmem [shape: f32[1,50], index: 4, kind: input, shape index: {}]   ;;  %s788_s5 = inlined_call_operand.hbm [shape: f32[2,50], index: 5, kind: output, shape index: {}]  }
   0x1   :  { %v28_v0 = vld [vmem:[%s784_s1 + $0x30] sm:$0x3]  ;;  %v27_v1 = vld [vmem:[%s784_s1 + $0x28] sm:$0xff]  ;;  %v26_v2 = vld [vmem:[%s784_s1 + $0x20] sm:$0xff] }
   0x2   :  { %v39_v3 = vsel %vm37_vm0, %v28_v0, 0  ;;  %v606_v4 = vand.u32 4294901760, %v27_v1  ;;  %v608_v5 = vand.u32 4294901760, %v26_v2  ;;  %v25_v6 = vld [vmem:[%s784_s1 + $0x18] sm:$0xff]  ;;  %v24_v7 = vld [vmem:[%s784_s1 + $0x10] sm:$0xff]  ;;  %v23_v8 = vld [vmem:[%s784_s1 + $0x8] sm:$0xff] }
   0x3   :  { %v619_v9 = vand.u32 4294901760, %v39_v3  ;;  %v621_v10 = vand.u32 4294901760, %v25_v6  ;;  %v623_v11 = vand.u32 4294901760, %v24_v7  ;;  %v625_v12 = vand.u32 4294901760, %v23_v8  ;;  %v22_v13 = vld [vmem:[%s784_s1] sm:$0xff] }
   0x4   :  { %v631_v14 = vsub.f32 %v27_v1, %v606_v4  ;;  %v634_v15 = vsub.f32 %v26_v2, %v608_v5  ;;  %v636_v16 = vand.u32 4294901760, %v22_v13  ;;  %v21_v17 = vld [vmem:[%s783_s0] sm:$0x3] }
   0x5   :  { %51 = vmatpush.msra.mxu0 %v619_v9  ;;  %v83_v18 = vsub.f32 %v39_v3, %v619_v9  ;;  %175 = vmatpush.msra.mxu3 %v619_v9  ;;  %v645_v19 = vsub.f32 %v25_v6, %v621_v10  ;;  %v648_v20 = vsub.f32 %v24_v7, %v623_v11  ;;  %v35_v21 = vsel %vm33_vm1, %v21_v17, 0 }
   0x6   :  { %10 = vsyncpa [#allocation3], 0  ;;  %v90_v22 = vand.u32 4294901760, %v631_v14  ;;  %v96_v23 = vand.u32 4294901760, %v634_v15  ;;  %v654_v24 = vsub.f32 %v23_v8, %v625_v12  ;;  %v658_v27 = vand.u32 4294901760, %v35_v21  ;;  %v273_v28 = vld [vmem:[%s786_s3 + $0x38] sm:$0xff] }
   0x7   :  { %53 = vmatpush.msra.mxu0 %v606_v4  ;;  %v84_v25 = vand.u32 4294901760, %v83_v18  ;;  %140 = vmatpush.msra.mxu2 %v83_v18  ;;  %v102_v26 = vand.u32 4294901760, %v645_v19  ;;  %v666_v30 = vsub.f32 %v22_v13, %v636_v16  ;;  %v108_v33 = vand.u32 4294901760, %v648_v20  ;;  %v272_v35 = vld [vmem:[%s786_s3 + $0x30] sm:$0xff]  ;;  %v271_v62 = vld [vmem:[%s786_s3 + $0x28] sm:$0xff]  ;;  %v270_v0 = vld [vmem:[%s786_s3 + $0x20] sm:$0xff] }
   0x8   :  { %v91_v29 = vsub.f32 %v631_v14, %v90_v22  ;;  %177 = vmatpush.msra.mxu3 %v606_v4  ;;  %v97_v32 = vsub.f32 %v634_v15, %v96_v23  ;;  %v674_v34 = vand.u32 4294901760, %v273_v28  ;;  %v114_v36 = vand.u32 4294901760, %v654_v24  ;;  %v269_v3 = vld [vmem:[%s786_s3 + $0x18] sm:$0xff]  ;;  %v268_v7 = vld [vmem:[%s786_s3 + $0x10] sm:$0xff]  ;;  %s566_s25 = smov [#allocation2]   ;;  %s528_s29 = sshll.u32 %s788_s5, 4  ;;  %s529_s29 = int_to_ptr.hbm [resolvable:$true] %s528_s29 }
   0x9   :  { %v85_v31 = vsub.f32 %v83_v18, %v84_v25  ;;  %55 = vmatpush.msra.mxu0 %v608_v5  ;;  %143 = vmatpush.msra.mxu2 %v631_v14  ;;  %v103_v39 = vsub.f32 %v645_v19, %v102_v26  ;;  %v65_v40 = vsub.f32 %v35_v21, %v658_v27  ;;  %v691_v42 = vand.u32 4294901760, %v272_v35  ;;  %v266_v18 = vld [vmem:[%s786_s3] sm:$0xff]  ;;  %s526_s26 = sshll.u32 %s566_s25, 4  ;;  %s527_s26 = int_to_ptr.vmem [resolvable:$true] %s526_s26 }
   0xa   :  { %179 = vmatpush.msra.mxu3 %v608_v5  ;;  %v92_v38 = vand.u32 4294901760, %v91_v29  ;;  %v689_v41 = vsub.f32 %v273_v28, %v674_v34  ;;  %v98_v43 = vand.u32 4294901760, %v97_v32  ;;  %v109_v44 = vsub.f32 %v648_v20, %v108_v33 }
   0xb   :  { %v86_v37 = vand.u32 4294901760, %v85_v31  ;;  %57 = vmatpush.msra.mxu0 %v621_v10  ;;  %146 = vmatpush.msra.mxu2 %v634_v15  ;;  %v120_v45 = vand.u32 4294901760, %v666_v30  ;;  %v66_v46 = vand.u32 4294901760, %v65_v40  ;;  %v700_v48 = vsub.f32 %v272_v35, %v691_v42  ;;  %v538_v35 = vld [vmem:[%s785_s2] ss:$0 sm:$0xff] }
   0xc   :  { %181 = vmatpush.msra.mxu3 %v621_v10  ;;  %v325_v47 = vand.u32 4294901760, %v689_v41  ;;  %v104_v49 = vand.u32 4294901760, %v103_v39  ;;  %v115_v50 = vsub.f32 %v654_v24, %v114_v36  ;;  %v110_v54 = vand.u32 4294901760, %v109_v44 }
   0xd   :  { %87 = vmatpush.msra.mxu1 %v86_v37  ;;  %59 = vmatpush.msra.mxu0 %v623_v11  ;;  %v67_v51 = vsub.f32 %v65_v40, %v66_v46  ;;  %v331_v53 = vand.u32 4294901760, %v700_v48  ;;  %v121_v55 = vsub.f32 %v666_v30, %v120_v45  ;;  %v741_v63 = vand.u32 4294901760, %v271_v62 }
   0xe   :  { %149 = vmatpush.msra.mxu2 %v645_v19  ;;  %183 = vmatpush.msra.mxu3 %v623_v11  ;;  %v326_v52 = vsub.f32 %v689_v41, %v325_v47  ;;  %v116_v56 = vand.u32 4294901760, %v115_v50  ;;  %v747_v2 = vand.u32 4294901760, %v270_v0  ;;  %v298_v6 = vand.u32 4294901760, %v269_v3 }
   0xf   :  { %93 = vmatpush.msra.mxu1 %v92_v38  ;;  %61 = vmatpush.msra.mxu0 %v625_v12  ;;  %v68_v57 = vand.u32 4294901760, %v67_v51  ;;  %v332_v58 = vsub.f32 %v700_v48, %v331_v53  ;;  %v122_v60 = vand.u32 4294901760, %v121_v55  ;;  %v336_v1 = vsub.f32 %v271_v62, %v741_v63 }
  0x10   :  { %152 = vmatpush.msra.mxu2 %v648_v20  ;;  %185 = vmatpush.msra.mxu3 %v625_v12  ;;  %v327_v59 = vand.u32 4294901760, %v326_v52  ;;  %vm278_vm2 = vcmask 523264   ;;  %vm519_vm3 = vcmask 402432  }
  0x11   :  { %99 = vmatpush.msra.mxu1 %v98_v43  ;;  %63 = vmatpush.msra.mxu0 %v636_v16  ;;  %v333_v61 = vand.u32 4294901760, %v332_v58 }
  0x12   :  { %155 = vmatpush.msra.mxu2 %v654_v24  ;;  %187 = vmatpush.msra.mxu3 %v636_v16 }
  0x13   :  { %207 = vmatpush.msrb.mxu0 %v84_v25  ;;  %105 = vmatpush.msra.mxu1 %v104_v49 }
  0x14   :  { %158 = vmatpush.msra.mxu2 %v666_v30  ;;  %191 = vmatmul.f32.vlgmr.msra.gmra.mxu3 %v66_v46 }
  0x15   :  { %211 = vmatpush.msrb.mxu0 %v90_v22  ;;  %111 = vmatpush.msra.mxu1 %v110_v54  ;;  %v304_v22 = vand.u32 4294901760, %v266_v18  ;;  %v539_v54 = vld [vmem:[%s787_s4] ss:$0 sm:$0xff] }
  0x16   :  { %161 = vmatmul.f32.vlgmr.msra.gmra.mxu2 %v65_v40  ;;  %69 = vmatmul.f32.vlgmr.msra.gmra.mxu0 %v68_v57 }
  0x17   :  { %215 = vmatpush.msrb.mxu0 %v96_v23  ;;  %117 = vmatpush.msra.mxu1 %v116_v56 }
  0x18   :  { %328 = vmatpush.msrb.mxu3 %v327_v59  ;;  %291 = vmatpush.msrb.mxu2 %v674_v34 }
  0x19   :  { %219 = vmatpush.msrb.mxu0 %v102_v26  ;;  %123 = vmatpush.msra.mxu1 %v122_v60  ;;  %v366_v26 = vsub.f32 %v266_v18, %v304_v22 }
  0x1a   :  { %125 = vmatmul.f32.vlgmr.msra.gmra.mxu1 %v658_v27  ;;  %334 = vmatpush.msrb.mxu3 %v333_v61 }
  0x1b   :  { %247 = vmatpush.msrb.mxu1 %v619_v9  ;;  %223 = vmatpush.msrb.mxu0 %v108_v33  ;;  %v367_v29 = vand.u32 4294901760, %v366_v26 }
  0x1c   :  { %293 = vmatpush.msrb.mxu2 %v691_v42 }
  0x1d   :  { %249 = vmatpush.msrb.mxu1 %v606_v4  ;;  %227 = vmatpush.msrb.mxu0 %v114_v36  ;;  %v337_v4 = vand.u32 4294901760, %v336_v1  ;;  %v368_v31 = vsub.f32 %v366_v26, %v367_v29 }
  0x1e   :  { %295 = vmatpush.msrb.mxu2 %v741_v63 }
  0x1f   :  { %251 = vmatpush.msrb.mxu1 %v608_v5  ;;  %231 = vmatpush.msrb.mxu0 %v120_v45  ;;  %v342_v5 = vsub.f32 %v270_v0, %v747_v2  ;;  %v338_v8 = vsub.f32 %v336_v1, %v337_v4  ;;  %v369_v33 = vand.u32 4294901760, %v368_v31 }
  0x20   :  { %233 = vmatmul.f32.vlgmr.msrb.gmra.mxu0 %v658_v27  ;;  %297 = vmatpush.msrb.mxu2 %v747_v2 }
  0x21   :  { %253 = vmatpush.msrb.mxu1 %v621_v10  ;;  %386 = vmatpush.msra.mxu0 %v689_v41  ;;  %v343_v9 = vand.u32 4294901760, %v342_v5  ;;  %v348_v10 = vsub.f32 %v269_v3, %v298_v6  ;;  %v339_v13 = vand.u32 4294901760, %v338_v8 }
  0x22   :  { %299 = vmatpush.msrb.mxu2 %v298_v6 }
  0x23   :  { %255 = vmatpush.msrb.mxu1 %v623_v11  ;;  %389 = vmatpush.msra.mxu0 %v700_v48  ;;  %v300_v11 = vand.u32 4294901760, %v268_v7  ;;  %v344_v14 = vsub.f32 %v342_v5, %v343_v9  ;;  %v349_v15 = vand.u32 4294901760, %v348_v10 }
  0x24   :  { %340 = vmatpush.msrb.mxu3 %v339_v13 }
  0x25   :  { %257 = vmatpush.msrb.mxu1 %v625_v12  ;;  %392 = vmatpush.msra.mxu0 %v336_v1  ;;  %v267_v12 = vld [vmem:[%s786_s3 + $0x8] sm:$0xff]  ;;  %v345_v19 = vand.u32 4294901760, %v344_v14  ;;  %v350_v20 = vsub.f32 %v348_v10, %v349_v15 }
  0x26   :  { %301 = vmatpush.msrb.mxu2 %v300_v11  ;;  %v302_v17 = vand.u32 4294901760, %v267_v12 }
  0x27   :  { %259 = vmatpush.msrb.mxu1 %v636_v16  ;;  %395 = vmatpush.msra.mxu0 %v342_v5  ;;  %v354_v16 = vsub.f32 %v268_v7, %v300_v11  ;;  %v351_v24 = vand.u32 4294901760, %v350_v20 }
  0x28   :  { %261 = vmatmul.f32.vlgmr.msrb.gmra.mxu1 %v658_v27  ;;  %v360_v23 = vsub.f32 %v267_v12, %v302_v17  ;;  %303 = vmatpush.msrb.mxu2 %v302_v17 }
  0x29   :  { %423 = vmatpush.msra.mxu1 %v674_v34  ;;  %398 = vmatpush.msra.mxu0 %v348_v10  ;;  %v355_v21 = vand.u32 4294901760, %v354_v16 }
  0x2a   :  { %346 = vmatpush.msrb.mxu3 %v345_v19  ;;  %v361_v27 = vand.u32 4294901760, %v360_v23  ;;  %305 = vmatpush.msrb.mxu2 %v304_v22 }
  0x2b   :  { %425 = vmatpush.msra.mxu1 %v691_v42  ;;  %401 = vmatpush.msra.mxu0 %v354_v16  ;;  %v356_v25 = vsub.f32 %v354_v16, %v355_v21 }
  0x2c   :  { %352 = vmatpush.msrb.mxu3 %v351_v24  ;;  %456 = vmatpush.msra.mxu2 %v325_v47  ;;  %v362_v30 = vsub.f32 %v360_v23, %v361_v27 }
  0x2d   :  { %427 = vmatpush.msra.mxu1 %v741_v63  ;;  %404 = vmatpush.msra.mxu0 %v360_v23  ;;  %v357_v28 = vand.u32 4294901760, %v356_v25 }
  0x2e   :  { %460 = vmatpush.msra.mxu2 %v331_v53  ;;  %v363_v32 = vand.u32 4294901760, %v362_v30 }
  0x2f   :  { %429 = vmatpush.msra.mxu1 %v747_v2  ;;  %407 = vmatpush.msra.mxu0 %v366_v26 }
  0x30   :  { %358 = vmatpush.msrb.mxu3 %v357_v28  ;;  %464 = vmatpush.msra.mxu2 %v337_v4 }
  0x31   :  { %431 = vmatpush.msra.mxu1 %v298_v6 }
  0x32   :  { %364 = vmatpush.msrb.mxu3 %v363_v32  ;;  %468 = vmatpush.msra.mxu2 %v343_v9 }
  0x33   :  { %433 = vmatpush.msra.mxu1 %v300_v11 }
  0x34   :  { %370 = vmatpush.msrb.mxu3 %v369_v33  ;;  %472 = vmatpush.msra.mxu2 %v349_v15 }
  0x35   :  { %435 = vmatpush.msra.mxu1 %v302_v17 }
  0x36   :  { %499 = vmatpush.msra.mxu3 %v674_v34  ;;  %476 = vmatpush.msra.mxu2 %v355_v21 }
  0x37   :  { %437 = vmatpush.msra.mxu1 %v304_v22 }
  0x38   :  { %501 = vmatpush.msra.mxu3 %v691_v42  ;;  %480 = vmatpush.msra.mxu2 %v361_v27 }
  0x3a   :  { %503 = vmatpush.msra.mxu3 %v741_v63  ;;  %484 = vmatpush.msra.mxu2 %v367_v29 }
  0x3c   :  { %505 = vmatpush.msra.mxu3 %v747_v2 }
  0x3e   :  { %507 = vmatpush.msra.mxu3 %v298_v6 }
  0x40   :  { %509 = vmatpush.msra.mxu3 %v300_v11 }
  0x42   :  { %511 = vmatpush.msra.mxu3 %v302_v17 }
  0x44   :  { %513 = vmatpush.msra.mxu3 %v304_v22 }
  0x93   :  { %v70_v36 = vpop.f32.mrf.mxu0 }
  0x94   :  { %v71_v34 = vadd.f32 %v538_v35, %v70_v36 }
  0x97   :  { %v126_v37 = vpop.f32.mrf.mxu1  ;;  %v192_v40 = vpop.f32.mrf.mxu3 }
  0x98   :  { %v127_v39 = vadd.f32 %v126_v37, %v71_v34 }
  0x99   :  { %v162_v38 = vpop.f32.mrf.mxu2 }
  0x9a   :  { %v163_v41 = vadd.f32 %v162_v38, %v127_v39 }
  0x9c   :  { %v193_v42 = vadd.f32 %v192_v40, %v163_v41 }
  0x9d   :  { %v234_v43 = vpop.f32.mrf.mxu0 }
  0x9e   :  { %v235_v44 = vadd.f32 %v234_v43, %v193_v42 }
  0xa5   :  { %v262_v45 = vpop.f32.mrf.mxu1 }
  0xa6   :  { %v263_v46 = vadd.f32 %v262_v45, %v235_v44 }
  0xa8   :  { %v265_v47 = vmax.f32 %v263_v46, 0.0 }
  0xaa   :  { %v280_v48 = vsel %vm278_vm2, %v265_v47, 0 }
  0xab   :  { %v306_v49 = vand.u32 4294901760, %v280_v48 }
  0xad   :  { %v307_v50 = vsub.f32 %v280_v48, %v306_v49  ;;  %372 = vmatmul.f32.vlgmr.msrb.gmra.mxu3 %v306_v49 }
  0xaf   :  { %410 = vmatmul.f32.vlgmr.msra.gmra.mxu0 %v307_v50  ;;  %v308_v51 = vand.u32 4294901760, %v307_v50 }
  0xb1   :  { %441 = vmatmul.f32.vlgmr.msra.gmra.mxu1 %v308_v51  ;;  %v309_v52 = vsub.f32 %v307_v50, %v308_v51 }
  0xb3   :  { %v310_v53 = vand.u32 4294901760, %v309_v52 }
  0xb5   :  { %311 = vmatmul.f32.vlgmr.msrb.gmra.mxu2 %v310_v53  ;;  %515 = vmatmul.f32.vlgmr.msra.gmra.mxu3 %v306_v49 }
  0xbd   :  { %486 = vmatmul.f32.vlgmr.msra.gmra.mxu2 %v306_v49 }
 0x12c   :  { %v411_v59 = vpop.f32.mrf.mxu0 }
 0x12e   :  { %v442_v61 = vpop.f32.mrf.mxu1 }
 0x130   :  { %v373_v55 = vpop.f32.mrf.mxu3 }
 0x138   :  { %v312_v56 = vpop.f32.mrf.mxu2  ;;  %v516_v1 = vpop.f32.mrf.mxu3 }
 0x139   :  { %v313_v57 = vadd.f32 %v539_v54, %v312_v56 }
 0x13b   :  { %v374_v58 = vadd.f32 %v373_v55, %v313_v57 }
 0x13d   :  { %v412_v60 = vadd.f32 %v411_v59, %v374_v58 }
 0x13f   :  { %v443_v62 = vadd.f32 %v442_v61, %v412_v60 }
 0x140   :  { %v487_v63 = vpop.f32.mrf.mxu2 }
 0x141   :  { %v488_v0 = vadd.f32 %v487_v63, %v443_v62 }
 0x143   :  { %v517_v2 = vadd.f32 %v516_v1, %v488_v0 }
 0x145   :  { %520 = vst.msk [vmem:[#allocation2] sm:$0x3] %vm519_vm3, %v517_v2 }
 0x146   :  { %531 = dma.vmem_to_hbm [thread:$0]  %s527_s26, 32, %s529_s29, [#allocation3]  }
 0x147   :  { %564 = dma.done.wait [#allocation3], 32  }
 0x148   :  { %565 = vsyncadd [#allocation3], 4294967264 }
 0x149   :  { %536 = vsyncpa [#allocation3], 1 }

</bundles_post_ra>
